<compile_context>
chip_gen: v6e
topology: v6e:2x2x1
jax: 0.10.0
libtpu: 0.0.40
codegen_flags: <defaults>
</compile_context>

<pallas_src>
import functools

import numpy as np
import jax
import jax.numpy as jnp
from jax.experimental import pallas as pl
from jax.experimental.pallas import tpu as pltpu

MANTISA_BIT = 8
EXP_BIT = 8  # bookkeeping only: shared exponents come from the offline opt_exp_act_list


def _toeplitz_conv_weights(w_oihw, W, C, dtype=jnp.bfloat16):
    """3x3 / stride-1 / pad-1 conv as one stacked banded matmul weight.

    Returns T of shape (3*W*C, W*C) such that, for lane-dense rows
    X[h, u*C + ci] = in[ci, h, u]:
        out[h, o*C + co] = concat([X[h-1], X[h], X[h+1]], axis=-1) @ T
    with out-of-range rows treated as zero.  Horizontal zero padding is folded into
    the band (out-of-range kx taps simply have no rows).
    """
    w = jnp.transpose(w_oihw, (2, 3, 1, 0))            # OIHW -> (ky, kx, ci, co)
    u = jnp.arange(W)[:, None]                         # input column
    o = jnp.arange(W)[None, :]                         # output column
    kx = u - o + 1                                     # tap index, valid in [0, 2]
    valid = (kx >= 0) & (kx <= 2)
    kx = jnp.clip(kx, 0, 2)
    blocks = jnp.where(valid[None, :, :, None, None], w[:, kx], 0.0)  # (3, W, W, C, C)
    t = jnp.transpose(blocks, (0, 1, 3, 2, 4)).reshape(3 * W * C, W * C)
    return t.astype(dtype)


def _basic_block_kernel(x_ref, t1_ref, t2_ref, qp_ref, out_ref, *, H, mantisa_bit):
    # x_ref:   (M, W*C) f32  — M = G*H rows of G whole batch items (no halo rows)
    # t1, t2:  (3*W*C, W*C) bf16 — stacked [ky=0; ky=1; ky=2] banded conv weights
    # qp_ref:  (8, W*C) f32  — rows [b1, inv_s1, s1, b2, inv_s2, s2, 0, 0] (tiled / W)
    # out_ref: (M, W*C) f32
    M, WC = x_ref.shape
    lim = float(2 ** (mantisa_bit - 1))

    # Quant params: one aligned (8, 128) load, then slices of the loaded value.
    qp = qp_ref[...]
    b1, inv_s1, s1 = qp[0:1, :], qp[1:2, :], qp[2:3, :]
    b2, inv_s2, s2 = qp[3:4, :], qp[4:5, :], qp[5:6, :]

    # Per-item vertical halo masks (items are stacked along M, each H rows tall);
    # they also kill cross-item contamination from the wrap-around of the rolls.
    row = jax.lax.broadcasted_iota(jnp.int32, (M, WC), 0)
    top_mask = (row % H) != 0          # row h-1 exists within the same item
    bot_mask = (row % H) != (H - 1)    # row h+1 exists within the same item

    def fused_conv3x3(v, t_ref, bias):
        # v: (M, WC) f32.  Build the K = 3*WC fused LHS:
        #   up[h]   = v[h-1]  (zero at each item's first row)
        #   down[h] = v[h+1]  (zero at each item's last row)
        # pltpu.roll follows jnp.roll semantics; shift M-1 == shift -1.
        up = jnp.where(top_mask, pltpu.roll(v, shift=1, axis=0), 0.0)
        down = jnp.where(bot_mask, pltpu.roll(v, shift=M - 1, axis=0), 0.0)
        lhs = jnp.concatenate([up, v, down], axis=-1).astype(jnp.bfloat16)
        return jnp.dot(lhs, t_ref[...], preferred_element_type=jnp.float32) + bias

    def bfp_quant(v, inv_scale, scale):
        # TODO(synk): BFPActivation.transform_activation_offline is not defined in the
        # provided snippet; this is standard block-floating-point quantization against
        # the offline per-channel shared exponent (mantissa clamp + round-half-even).
        return jnp.clip(jnp.round(v * inv_scale), -lim, lim - 1.0) * scale

    x = x_ref[...]                                                    # f32 residual
    out1 = jnp.maximum(bfp_quant(fused_conv3x3(x, t1_ref, b1), inv_s1, s1), 0.0)
    out2 = bfp_quant(fused_conv3x3(out1, t2_ref, b2), inv_s2, s2)
    # Residual add (identity path: stride=1, downsample=None) + final ReLU.
    out_ref[...] = jnp.maximum(out2 + x, 0.0)


def _pick_group(N, H):
    """Batch items folded per grid step: target ~128 matmul rows (M = G*H) while
    keeping >= 2 grid steps when the batch allows (v7x has 2 TensorCores)."""
    g = max(1, min(N, -(-128 // H)))     # ceil(128 / H), capped at N
    while g > 1 and (N // g) < 2:
        g -= 1
    while N % g:
        g -= 1
    return g


def basic_block_forward(x_nchw, params, *, mantisa_bit=MANTISA_BIT):
    N, C, H, W = x_nchw.shape
    WC = W * C
    G = _pick_group(N, H)
    M = G * H
    # Lane-dense layout: last dim (W*C) -> 128-wide lane axis, rows -> sublanes.
    assert M % 8 == 0 and WC % 128 == 0, (M, WC)

    # NCHW -> (N*H, W*C) rows; the f32 slab doubles as the exact residual.
    x2d = jnp.transpose(x_nchw, (0, 2, 3, 1)).astype(jnp.float32).reshape(N * H, WC)

    # Stacked banded conv-as-matmul weights (bf16, K = 3*W*C = 384 here).
    t1 = _toeplitz_conv_weights(params["w1"], W, C)
    t2 = _toeplitz_conv_weights(params["w2"], W, C)

    def tile_c(v):
        return jnp.tile(v.astype(jnp.float32).reshape(1, C), (1, W))   # (1, WC)

    m1 = float(mantisa_bit) - 1.0
    e1 = params["e1"].astype(jnp.float32)
    e2 = params["e2"].astype(jnp.float32)
    qp = jnp.concatenate([
        tile_c(params["b1"]), tile_c(jnp.exp2(m1 - e1)), tile_c(jnp.exp2(e1 - m1)),
        tile_c(params["b2"]), tile_c(jnp.exp2(m1 - e2)), tile_c(jnp.exp2(e2 - m1)),
        jnp.zeros((2, WC), jnp.float32),   # pad to 8 rows: one aligned vreg load
    ], axis=0)                              # (8, WC)

    kernel = functools.partial(_basic_block_kernel, H=H, mantisa_bit=mantisa_bit)
    out2d = pl.pallas_call(
        kernel,
        out_shape=jax.ShapeDtypeStruct((N * H, WC), jnp.float32),
        grid_spec=pltpu.PrefetchScalarGridSpec(
            num_scalar_prefetch=0,
            grid=(N // G,),
            in_specs=[
                pl.BlockSpec((M, WC), lambda i: (i, 0)),
                # Constant-index blocks: Pallas does not re-DMA them across steps.
                # At real weight sizes, single-buffer them (pipeline_mode=pl.Buffered(1))
                # or stage them once in persistent scratch to reclaim VMEM headroom.
                pl.BlockSpec((3 * WC, WC), lambda i: (0, 0)),
                pl.BlockSpec((3 * WC, WC), lambda i: (0, 0)),
                pl.BlockSpec((8, WC), lambda i: (0, 0)),
            ],
            out_specs=pl.BlockSpec((M, WC), lambda i: (i, 0)),
        ),
        compiler_params=pltpu.CompilerParams(
            dimension_semantics=("parallel",)),   # batch groups are independent
    )(x2d, t1, t2, qp)

    return jnp.transpose(out2d.reshape(N, H, W, C), (0, 3, 1, 2))      # back to NCHW


def reference_forward(x_nchw, params, mantisa_bit=MANTISA_BIT):
    """Plain-JAX f32 reference mirroring the PyTorch forward, for verification."""
    def conv(x, w, b):
        y = jax.lax.conv_general_dilated(
            x, w, window_strides=(1, 1), padding=((1, 1), (1, 1)),
            dimension_numbers=("NCHW", "OIHW", "NCHW"))
        return y + b[None, :, None, None]

    def quant(v, e):
        scale = jnp.exp2(e[None, :, None, None] - (mantisa_bit - 1.0))
        lim = float(2 ** (mantisa_bit - 1))
        return jnp.clip(jnp.round(v / scale), -lim, lim - 1.0) * scale

    out = conv(x_nchw, params["w1"], params["b1"])
    out = jnp.maximum(quant(out, params["e1"]), 0.0)
    out = conv(out, params["w2"], params["b2"])
    out = quant(out, params["e2"])
    return jnp.maximum(out + x_nchw, 0.0)


if __name__ == "__main__":
    key = jax.random.PRNGKey(0)
    N, C, H, W = 2, 8, 16, 16          # inplanes == planes, stride=1, downsample=None
    kx, k1, k2, kb1, kb2 = jax.random.split(key, 5)
    x = jax.random.normal(kx, (N, C, H, W), jnp.float32)
    params = {
        "w1": jax.random.normal(k1, (C, C, 3, 3), jnp.float32) * 0.1,   # conv1 (OIHW)
        "b1": jax.random.normal(kb1, (C,), jnp.float32) * 0.05,
        "w2": jax.random.normal(k2, (C, C, 3, 3), jnp.float32) * 0.1,   # conv2 (OIHW)
        "b2": jax.random.normal(kb2, (C,), jnp.float32) * 0.05,
        "e1": jnp.full((C,), 2.0, jnp.float32),  # offline "optimal" shared exponents
        "e2": jnp.full((C,), 2.0, jnp.float32),
    }

    out = jax.block_until_ready(basic_block_forward(x, params))
    ref = jax.block_until_ready(reference_forward(x, params))
    assert out.shape == (N, C, H, W) and out.dtype == jnp.float32
    # generous tolerance: bf16 matmul operands + BFP rounding ties can shift a value
    # by ~one quantization step (2^-5 = 0.03125 at these exponents) through two convs
    np.testing.assert_allclose(np.asarray(out), np.asarray(ref), atol=0.25)
    print("KERNEL_OK")
</pallas_src>

<mosaic_0001>
module attributes {stable_mosaic.version = 11 : i64} {
  func.func @_basic_block_kernel(%arg0: i32, %arg1: memref<16x128xf32, #tpu.memory_space<vmem>>, %arg2: memref<384x128xbf16, #tpu.memory_space<vmem>>, %arg3: memref<384x128xbf16, #tpu.memory_space<vmem>>, %arg4: memref<8x128xf32, #tpu.memory_space<vmem>>, %arg5: memref<16x128xf32, #tpu.memory_space<vmem>>) attributes {dimension_semantics = [#tpu.dimension_semantics<parallel>], iteration_bounds = array<i64: 2>, scalar_prefetch = 0 : i64, scratch_operands = 0 : i64, tpu.core_type = #tpu.core_type<tc>, window_params = [{transform_indices = @transform_0, window_bounds = array<i64: 16, 128>}, {pipeline_mode = #tpu.pipeline_mode<synchronous>, transform_indices = @transform_1, window_bounds = array<i64: 384, 128>}, {pipeline_mode = #tpu.pipeline_mode<synchronous>, transform_indices = @transform_2, window_bounds = array<i64: 384, 128>}, {pipeline_mode = #tpu.pipeline_mode<synchronous>, transform_indices = @transform_3, window_bounds = array<i64: 8, 128>}, {transform_indices = @transform_4, window_bounds = array<i64: 16, 128>}]} {
    %c0 = arith.constant 0 : index
    %c0_0 = arith.constant 0 : index
    %0 = vector.load %arg4[%c0, %c0_0] : memref<8x128xf32, #tpu.memory_space<vmem>>, vector<8x128xf32>
    %1 = vector.extract_strided_slice %0 {offsets = [0, 0], sizes = [1, 128], strides = [1, 1]} : vector<8x128xf32> to vector<1x128xf32>
    %2 = vector.extract_strided_slice %0 {offsets = [1, 0], sizes = [1, 128], strides = [1, 1]} : vector<8x128xf32> to vector<1x128xf32>
    %3 = vector.extract_strided_slice %0 {offsets = [2, 0], sizes = [1, 128], strides = [1, 1]} : vector<8x128xf32> to vector<1x128xf32>
    %4 = vector.extract_strided_slice %0 {offsets = [3, 0], sizes = [1, 128], strides = [1, 1]} : vector<8x128xf32> to vector<1x128xf32>
    %5 = vector.extract_strided_slice %0 {offsets = [4, 0], sizes = [1, 128], strides = [1, 1]} : vector<8x128xf32> to vector<1x128xf32>
    %6 = vector.extract_strided_slice %0 {offsets = [5, 0], sizes = [1, 128], strides = [1, 1]} : vector<8x128xf32> to vector<1x128xf32>
    %7 = tpu.iota {dimensions = array<i32: 0>} : vector<16x128xi32>
    %c16_i32 = arith.constant 16 : i32
    %c0_i32 = arith.constant 0 : i32
    %8 = arith.cmpi eq, %c16_i32, %c0_i32 : i32
    %c1_i32 = arith.constant 1 : i32
    %9 = arith.select %8, %c1_i32, %c16_i32 : i32
    %10 = vector.broadcast %9 : i32 to vector<16x128xi32>
    %11 = arith.remsi %7, %10 : vector<16x128xi32>
    %c0_i32_1 = arith.constant 0 : i32
    %12 = vector.broadcast %c0_i32_1 : i32 to vector<16x128xi32>
    %13 = arith.cmpi ne, %11, %12 : vector<16x128xi32>
    %c0_i32_2 = arith.constant 0 : i32
    %14 = vector.broadcast %c0_i32_2 : i32 to vector<16x128xi32>
    %15 = arith.cmpi slt, %11, %14 : vector<16x128xi32>
    %c0_i32_3 = arith.constant 0 : i32
    %16 = arith.cmpi slt, %9, %c0_i32_3 : i32
    %17 = vector.broadcast %16 : i1 to vector<16x128xi1>
    %18 = vector.broadcast %17 : vector<16x128xi1> to vector<16x128xi1>
    %19 = arith.xori %15, %18 : vector<16x128xi1>
    %20 = arith.andi %19, %13 : vector<16x128xi1>
    %21 = vector.broadcast %9 : i32 to vector<16x128xi32>
    %22 = arith.addi %11, %21 : vector<16x128xi32>
    %23 = arith.select %20, %22, %11 : vector<16x128xi1>, vector<16x128xi32>
    %c0_i32_4 = arith.constant 0 : i32
    %24 = vector.broadcast %c0_i32_4 : i32 to vector<16x128xi32>
    %25 = arith.cmpi ne, %23, %24 : vector<16x128xi32>
    %c16_i32_5 = arith.constant 16 : i32
    %c0_i32_6 = arith.constant 0 : i32
    %26 = arith.cmpi eq, %c16_i32_5, %c0_i32_6 : i32
    %c1_i32_7 = arith.constant 1 : i32
    %27 = arith.select %26, %c1_i32_7, %c16_i32_5 : i32
    %28 = vector.broadcast %27 : i32 to vector<16x128xi32>
    %29 = arith.remsi %7, %28 : vector<16x128xi32>
    %c0_i32_8 = arith.constant 0 : i32
    %30 = vector.broadcast %c0_i32_8 : i32 to vector<16x128xi32>
    %31 = arith.cmpi ne, %29, %30 : vector<16x128xi32>
    %c0_i32_9 = arith.constant 0 : i32
    %32 = vector.broadcast %c0_i32_9 : i32 to vector<16x128xi32>
    %33 = arith.cmpi slt, %29, %32 : vector<16x128xi32>
    %c0_i32_10 = arith.constant 0 : i32
    %34 = arith.cmpi slt, %27, %c0_i32_10 : i32
    %35 = vector.broadcast %34 : i1 to vector<16x128xi1>
    %36 = vector.broadcast %35 : vector<16x128xi1> to vector<16x128xi1>
    %37 = arith.xori %33, %36 : vector<16x128xi1>
    %38 = arith.andi %37, %31 : vector<16x128xi1>
    %39 = vector.broadcast %27 : i32 to vector<16x128xi32>
    %40 = arith.addi %29, %39 : vector<16x128xi32>
    %41 = arith.select %38, %40, %29 : vector<16x128xi1>, vector<16x128xi32>
    %c15_i32 = arith.constant 15 : i32
    %42 = vector.broadcast %c15_i32 : i32 to vector<16x128xi32>
    %43 = arith.cmpi ne, %41, %42 : vector<16x128xi32>
    %c0_11 = arith.constant 0 : index
    %c0_12 = arith.constant 0 : index
    %44 = vector.load %arg1[%c0_11, %c0_12] : memref<16x128xf32, #tpu.memory_space<vmem>>, vector<16x128xf32>
    %c1_i32_13 = arith.constant 1 : i32
    %45 = tpu.dynamic_rotate %44 by %c1_i32_13 dim 0 : vector<16x128xf32>, i32 -> vector<16x128xf32>
    %cst = arith.constant 0.000000e+00 : f32
    %46 = vector.broadcast %cst : f32 to vector<16x128xf32>
    %47 = arith.select %25, %45, %46 : vector<16x128xi1>, vector<16x128xf32>
    %c15_i32_14 = arith.constant 15 : i32
    %48 = tpu.dynamic_rotate %44 by %c15_i32_14 dim 0 : vector<16x128xf32>, i32 -> vector<16x128xf32>
    %cst_15 = arith.constant 0.000000e+00 : f32
    %49 = vector.broadcast %cst_15 : f32 to vector<16x128xf32>
    %50 = arith.select %43, %48, %49 : vector<16x128xi1>, vector<16x128xf32>
    %51 = tpu.concatenate %47, %44, %50 in 1 : vector<16x128xf32>, vector<16x128xf32>, vector<16x128xf32> -> vector<16x384xf32>
    %52 = arith.truncf %51 : vector<16x384xf32> to vector<16x384xbf16>
    %c0_16 = arith.constant 0 : index
    %c0_17 = arith.constant 0 : index
    %53 = vector.load %arg2[%c0_16, %c0_17] : memref<384x128xbf16, #tpu.memory_space<vmem>>, vector<384x128xbf16>
    %cst_18 = arith.constant dense<0.000000e+00> : vector<16x128xf32>
    %54 = tpu.matmul %52, %53, %cst_18 {dimension_numbers = #tpu.dot_dimension_numbers<[1], [0], [0], [1], [0, 0, 1, 1], [], []>} : vector<16x384xbf16>, vector<384x128xbf16>, vector<16x128xf32> -> vector<16x128xf32>
    %55 = vector.broadcast %1 : vector<1x128xf32> to vector<16x128xf32>
    %56 = arith.addf %54, %55 : vector<16x128xf32>
    %57 = vector.broadcast %2 : vector<1x128xf32> to vector<16x128xf32>
    %58 = arith.mulf %56, %57 : vector<16x128xf32>
    %59 = math.roundeven %58 : vector<16x128xf32>
    %cst_19 = arith.constant -1.280000e+02 : f32
    %cst_20 = arith.constant 1.270000e+02 : f32
    %60 = vector.broadcast %cst_19 : f32 to vector<16x128xf32>
    %61 = arith.maximumf %60, %59 : vector<16x128xf32>
    %62 = vector.broadcast %cst_20 : f32 to vector<16x128xf32>
    %63 = arith.minimumf %62, %61 : vector<16x128xf32>
    %64 = vector.broadcast %3 : vector<1x128xf32> to vector<16x128xf32>
    %65 = arith.mulf %63, %64 : vector<16x128xf32>
    %cst_21 = arith.constant 0.000000e+00 : f32
    %66 = vector.broadcast %cst_21 : f32 to vector<16x128xf32>
    %67 = arith.maximumf %65, %66 : vector<16x128xf32>
    %c1_i32_22 = arith.constant 1 : i32
    %68 = tpu.dynamic_rotate %67 by %c1_i32_22 dim 0 : vector<16x128xf32>, i32 -> vector<16x128xf32>
    %cst_23 = arith.constant 0.000000e+00 : f32
    %69 = vector.broadcast %cst_23 : f32 to vector<16x128xf32>
    %70 = arith.select %25, %68, %69 : vector<16x128xi1>, vector<16x128xf32>
    %c15_i32_24 = arith.constant 15 : i32
    %71 = tpu.dynamic_rotate %67 by %c15_i32_24 dim 0 : vector<16x128xf32>, i32 -> vector<16x128xf32>
    %cst_25 = arith.constant 0.000000e+00 : f32
    %72 = vector.broadcast %cst_25 : f32 to vector<16x128xf32>
    %73 = arith.select %43, %71, %72 : vector<16x128xi1>, vector<16x128xf32>
    %74 = tpu.concatenate %70, %67, %73 in 1 : vector<16x128xf32>, vector<16x128xf32>, vector<16x128xf32> -> vector<16x384xf32>
    %75 = arith.truncf %74 : vector<16x384xf32> to vector<16x384xbf16>
    %c0_26 = arith.constant 0 : index
    %c0_27 = arith.constant 0 : index
    %76 = vector.load %arg3[%c0_26, %c0_27] : memref<384x128xbf16, #tpu.memory_space<vmem>>, vector<384x128xbf16>
    %cst_28 = arith.constant dense<0.000000e+00> : vector<16x128xf32>
    %77 = tpu.matmul %75, %76, %cst_28 {dimension_numbers = #tpu.dot_dimension_numbers<[1], [0], [0], [1], [0, 0, 1, 1], [], []>} : vector<16x384xbf16>, vector<384x128xbf16>, vector<16x128xf32> -> vector<16x128xf32>
    %78 = vector.broadcast %4 : vector<1x128xf32> to vector<16x128xf32>
    %79 = arith.addf %77, %78 : vector<16x128xf32>
    %80 = vector.broadcast %5 : vector<1x128xf32> to vector<16x128xf32>
    %81 = arith.mulf %79, %80 : vector<16x128xf32>
    %82 = math.roundeven %81 : vector<16x128xf32>
    %cst_29 = arith.constant -1.280000e+02 : f32
    %cst_30 = arith.constant 1.270000e+02 : f32
    %83 = vector.broadcast %cst_29 : f32 to vector<16x128xf32>
    %84 = arith.maximumf %83, %82 : vector<16x128xf32>
    %85 = vector.broadcast %cst_30 : f32 to vector<16x128xf32>
    %86 = arith.minimumf %85, %84 : vector<16x128xf32>
    %87 = vector.broadcast %6 : vector<1x128xf32> to vector<16x128xf32>
    %88 = arith.mulf %86, %87 : vector<16x128xf32>
    %89 = arith.addf %88, %44 : vector<16x128xf32>
    %cst_31 = arith.constant 0.000000e+00 : f32
    %90 = vector.broadcast %cst_31 : f32 to vector<16x128xf32>
    %91 = arith.maximumf %89, %90 : vector<16x128xf32>
    %c0_32 = arith.constant 0 : index
    %c0_33 = arith.constant 0 : index
    %92 = vector.load %arg5[%c0_32, %c0_33] : memref<16x128xf32, #tpu.memory_space<vmem>>, vector<16x128xf32>
    tpu.vector_store %arg5[%c0_32, %c0_33], %91 {strides = array<i32>} : memref<16x128xf32, #tpu.memory_space<vmem>>, vector<16x128xf32>,
    return
  }
  func.func @transform_0(%arg0: i32) -> (i32, i32) {
    %c0_i32 = arith.constant 0 : i32
    %c0_i32_0 = arith.constant 0 : i32
    return %arg0, %c0_i32 : i32, i32
  }
  func.func @transform_1(%arg0: i32) -> (i32, i32) {
    %c0_i32 = arith.constant 0 : i32
    %c0_i32_0 = arith.constant 0 : i32
    %c0_i32_1 = arith.constant 0 : i32
    return %c0_i32, %c0_i32_0 : i32, i32
  }
  func.func @transform_2(%arg0: i32) -> (i32, i32) {
    %c0_i32 = arith.constant 0 : i32
    %c0_i32_0 = arith.constant 0 : i32
    %c0_i32_1 = arith.constant 0 : i32
    return %c0_i32, %c0_i32_0 : i32, i32
  }
  func.func @transform_3(%arg0: i32) -> (i32, i32) {
    %c0_i32 = arith.constant 0 : i32
    %c0_i32_0 = arith.constant 0 : i32
    %c0_i32_1 = arith.constant 0 : i32
    return %c0_i32, %c0_i32_0 : i32, i32
  }
  func.func @transform_4(%arg0: i32) -> (i32, i32) {
    %c0_i32 = arith.constant 0 : i32
    %c0_i32_0 = arith.constant 0 : i32
    return %arg0, %c0_i32 : i32, i32
  }
}

</mosaic_0001>

<bundles_post_ra>
// kernel: tpu_custom_call.1
= control target key start
LH: loop header
LB: loop body
LE: loop exit
PB: predicated region body
PF: predicated region fallthrough
CT: control target
= control target key end

     0   :  { %9 = vsyncpa [#allocation3], 0  ;;  %s1910_s0 = inlined_call_operand.hbm [shape: f32[32,128], index: 0, kind: input, shape index: {}]   ;;  %s1911_s1 = inlined_call_operand.hbm [shape: bf16[384,128], index: 1, kind: input, shape index: {}]   ;;  %s1912_s2 = inlined_call_operand.hbm [shape: bf16[384,128], index: 2, kind: input, shape index: {}]   ;;  %s1913_s3 = inlined_call_operand.hbm [shape: f32[8,128], index: 3, kind: input, shape index: {}]   ;;  %s1914_s4 = inlined_call_operand.hbm [shape: f32[32,128], index: 4, kind: output, shape index: {}]  }
   0x1   :  { %11 = vsyncpa [#allocation3 + $0x1], 0 }
   0x2   :  { %12 = vsyncpa [#allocation6], 0 }
   0x3   :  { %13 = vsyncpa [#allocation9], 0 }
   0x4   :  { %14 = vsyncpa [#allocation4], 0 }
   0x5   :  { %16 = vsyncpa [#allocation4 + $0x1], 0  ;;  %s1612_s15 = smov 0   ;;  %s1614_s16 = smov 0  }
   0x6   :  { %s1616_s17 = smov 0   ;;  %s1618_s18 = smov 0  }
   0x7 LB: > { %s1633_s19 = sadd.s32 4294967295, %s1571_s18   ;;  %s1043_s20 = sadd.s32 4294967294, %s1571_s18   ;;  %s1571_s18 = sphi %s1618_s18, %s1944_s18   ;;  %s1567_s17 = sphi %s1616_s17, %s1943_s17   ;;  %s1563_s16 = sphi %s1614_s16, %s1942_s16   ;;  %s1559_s15 = sphi %s1612_s15, %s1941_s15  }
   0x8   : > { %p42_p0 = scmp.ne.s32.totalorder %s1563_s16, %s1559_s15  ;;  %p1915_p1 = scmp.eq.s32.totalorder %s1633_s19, 0 }
   0x9   : > { %p135_p3 = scmp.eq.s32.totalorder %s1043_s20, 1  ;;  %p1044_p5 = scmp.ge.s32.totalorder %s1571_s18, 1 }
   0xa   : > { %p1642_p4 = por %p1915_p1, %p42_p0  ;;  %p142_p7 = scmp.lt.s32.totalorder %s1571_s18, 3 }
   0xb   : > { %p1647_p6 = por %p135_p3, %p42_p0  ;;  %s1573_s24 = smov [#allocation5]  }
   0xc   : > { %s1919_s21 = scalar_select %p1642_p4, 1, 0 }
   0xd   : > { %s1920_s22 = scalar_select %p1647_p6, 1, 0 }
   0xe   : > { %p1652_p8 = pnand %p1044_p5, %p142_p7  ;;  %s154_s25 = sshll.u32 %s1573_s24, 4  ;;  %s155_s25 = int_to_ptr.vmem [resolvable:$true] %s154_s25 }
   0xf   : > { %s1574_s27 = smov [#allocation7]   ;;  %s1575_s29 = smov [#allocation8]  }
  0x10   : > { %s1921_s23 = scalar_select %p1652_p8, 1, 0 }
  0x11   : > { %p1275_p9 = pneg %p1652_p8  ;;  %s167_s28 = sshll.u32 %s1574_s27, 4  ;;  %s168_s28 = int_to_ptr.vmem [resolvable:$true] %s167_s28 }
  0x12   : > { %s181_s30 = sshll.u32 %s1575_s29, 4  ;;  %s1404_s5 = scalar_lea.vmem %s155_s25, 3072  ;;  %s182_s30 = int_to_ptr.vmem [resolvable:$true] %s181_s30 }
  0x13   : > { %p1661_p11 = pnand %p1275_p9, %p1915_p1  ;;  %p1405_p13 = scmp.ne.s32.totalorder %s155_s25, %s1404_s5 }
  0x14   : > { %p1412_p5 = scmp.lt.s32.totalorder %s155_s25, %s155_s25  ;;  %p1413_p7 = scmp.lt.s32.totalorder %s1404_s5, %s1404_s5 }
  0x15   : > { %p1395_p12 = pneg %p1661_p11 }
  0x16   : > { %p1414_p9 = por %p1413_p7, %p1412_p5 }
  0x17   : > { %p1407_p0 = pnand %p1405_p13, %p1395_p12 }
  0x19   : > { %p1408_p3 = pneg %p1407_p0 }
  0x1b   : > { %p1415_p10 = pnand %p1414_p9, %p1408_p3 }
  0x1d   : > { %1418 = shalt.err (!%p1415_p10)
}
  0x1e   : > { %s1576_s6 = smov 64   ;;  %s1577_s7 = smov 4  }
  0x1f   : > { %1278 = dma.hbm_to_vmem [thread:$0]  (!%p1661_p11), %s1911_s1, 3072, %s155_s25, [#allocation6], %s1576_s6, %s1576_s6, %s1577_s7  }
  0x20   : > { %s1430_s10 = scalar_lea.vmem %s168_s28, 3072  ;;  %p1438_p2 = scmp.lt.s32.totalorder %s168_s28, %s168_s28 }
  0x21   : > { %p1431_p1 = scmp.ne.s32.totalorder %s168_s28, %s1430_s10  ;;  %p1439_p6 = scmp.lt.s32.totalorder %s1430_s10, %s1430_s10 }
  0x23   : > { %p1433_p13 = pnand %p1431_p1, %p1395_p12  ;;  %p1440_p5 = por %p1439_p6, %p1438_p2 }
  0x25   : > { %p1434_p0 = pneg %p1433_p13 }
  0x27   : > { %p1441_p3 = pnand %p1440_p5, %p1434_p0 }
  0x29   : > { %1444 = shalt.err (!%p1441_p3)
}
  0x2a   : > { %1281 = dma.hbm_to_vmem [thread:$0]  (!%p1661_p11), %s1912_s2, 3072, %s168_s28, [#allocation6], %s1576_s6, %s1576_s6, %s1577_s7  }
  0x2b   : > { %s1456_s13 = scalar_lea.vmem %s182_s30, 128  ;;  %p1464_p9 = scmp.lt.s32.totalorder %s182_s30, %s182_s30 }
  0x2c   : > { %p1457_p10 = scmp.ne.s32.totalorder %s182_s30, %s1456_s13  ;;  %p1465_p13 = scmp.lt.s32.totalorder %s1456_s13, %s1456_s13 }
  0x2e   : > { %p1459_p7 = pnand %p1457_p10, %p1395_p12  ;;  %p1466_p4 = por %p1465_p13, %p1464_p9 }
  0x30   : > { %p1460_p1 = pneg %p1459_p7 }
  0x32   : > { %p1467_p2 = pnand %p1466_p4, %p1460_p1 }
  0x34   : > { %1470 = shalt.err (!%p1467_p2)
}
  0x35   : > { %1284 = dma.hbm_to_vmem [thread:$0]  (!%p1661_p11), %s1913_s3, 128, %s182_s30, [#allocation9]  }
  0x36   : > { %s1692_s24 = sadd.s32 1, %s1571_s18   ;;  %s29_s26 = sadd.s32 1, %s1567_s17 }
  0x37   : > { %s26_s25 = ssub.s32 %s1571_s18, %s1692_s24  ;;  %p36_p6 = scmp.ne.s32.totalorder %s1567_s17, %s1563_s16 }
  0x38   : > { %p27_p4 = scmp.eq.s32.totalorder %s26_s25, 0  ;;  %p37_p12 = scmp.eq.s32.totalorder %s1571_s18, 0 }
  0x39   : > { %p1296_p0 = scmp.lt.s32.totalorder %s1571_s18, 2  ;;  %p1923_p3 = scmp.eq.s32.totalorder %s1633_s19, 1 }
  0x3a   : > { %s1702_s27 = scalar_select %p27_p4, %s1567_s17, %s29_s26  }
  0x3b   : > { %p38_p5 = por %p37_p12, %p36_p6  ;;  %p1706_p10 = por %p1923_p3, %p36_p6 }
  0x3c   : > { %s192_s29 = sand.u32 1, %s1567_s17   ;;  %s1123_s5 = sshll.u32 %s1571_s18, 8 }
  0x3d   : > { %s1924_s28 = scalar_select %p1706_p10, 1, 0 }
  0x3e   : > { %s1049_s30 = sshll.u32 %s192_s29, 4  ;;  %s1715_s8 = scalar_lea.hbm %s1910_s0, %s1123_s5 }
  0x3f   : > { %s196_s9 = scalar_lea.vmem [#allocation2], %s1049_s30  ;;  %p1717_p11 = pnand %p1296_p0, %p38_p5 }
  0x40   : > { %s203_s10 = sshll.u32 %s196_s9, 4  ;;  %s1723_s12 = scalar_lea.sflag [#allocation3], %s192_s29  ;;  %s1721_s10 = int_to_ptr.vmem [resolvable:$true] %s203_s10 }
  0x41   : > { %s1471_s13 = scalar_lea.hbm %s1715_s8, 256  ;;  %p1473_p1 = pneg %p1717_p11 }
  0x42   : > { %p1472_p7 = scmp.ne.s32.totalorder %s1715_s8, %s1471_s13  ;;  %s1476_s25 = scalar_lea.hbm %s1910_s0, 512 }
  0x43   : > { %p1477_p2 = scmp.lt.s32.totalorder %s1715_s8, %s1910_s0  ;;  %p1478_p4 = scmp.lt.s32.totalorder %s1476_s25, %s1471_s13 }
  0x44   : > { %p1474_p9 = pnand %p1473_p1, %p1472_p7 }
  0x45   : > { %p1479_p6 = por %p1478_p4, %p1477_p2 }
  0x46   : > { %p1475_p13 = pneg %p1474_p9 }
  0x48   : > { %p1480_p12 = pnand %p1479_p6, %p1475_p13 }
  0x4a   : > { %1483 = shalt.err (!%p1480_p12)
}
  0x4b   : > { %s1484_s29 = scalar_lea.vmem %s1721_s10, 256  ;;  %s1578_s30 = smov [#allocation2]  }
  0x4c   : > { %p1485_p0 = scmp.ne.s32.totalorder %s1721_s10, %s1484_s29  ;;  %s1489_s6 = sshll.u32 %s1578_s30, 4  ;;  %s1490_s6 = int_to_ptr.vmem [resolvable:$false] %s1489_s6 }
  0x4d   : > { %s1491_s7 = scalar_lea.vmem %s1490_s6, 512  ;;  %p1492_p7 = scmp.lt.s32.totalorder %s1721_s10, %s1490_s6 }
  0x4e   : > { %p1487_p5 = pnand %p1485_p0, %p1473_p1  ;;  %p1493_p9 = scmp.lt.s32.totalorder %s1491_s7, %s1484_s29 }
  0x50   : > { %p1488_p3 = pneg %p1487_p5  ;;  %p1494_p10 = por %p1493_p9, %p1492_p7 }
  0x52   : > { %p1495_p8 = pnand %p1494_p10, %p1488_p3 }
  0x54   : > { %1498 = shalt.err (!%p1495_p8)
}
  0x55   : > { %s1579_s9 = smov 128   ;;  %s1580_s13 = smov 8  }
  0x56   : > { %1288 = dma.hbm_to_vmem [thread:$0]  (!%p1717_p11), %s1715_s8, 256, %s1721_s10, %s1723_s12, %s1579_s9, %s1579_s9, %s1580_s13  }
  0x57   : > { %p1926_p1 = scmp.ne.s32.totalorder %s1921_s23, 0 }
  0x58   : > { %s1747_s14 = sand.u32 (!%p1926_p1), 1, %s1563_s16   ;;  %p1927_p8 = scmp.ne.s32.totalorder (!%p1926_p1), %s1919_s21, 0 }
  0x59   : > { %215 = sbr.rel (%p1926_p1) target bundleno = 604 (0x25c), region = 36  ;;  %s1053_s20 = sshll.u32 (!%p1926_p1), %s1747_s14, 4 }
  0x5a   : > { %s218_s25 = scalar_lea.sflag (!%p1926_p1), [#allocation3], %s1747_s14  ;;  %s1753_s26 = scalar_lea.vmem (!%p1926_p1), [#allocation2], %s1053_s20 }
  0x5e   : > { %1542 = dma.done.wait (%p1927_p8), %s218_s25, 256  }
  0x5f   : > { %1544 = vsyncadd (%p1927_p8), %s218_s25, 4294967040  ;;  %p1928_p10 = scmp.eq.s32.totalorder %s1633_s19, 0 }
  0x61   : > { %1546 = dma.done.wait (%p1928_p10), [#allocation6], 6144   ;;  %p1929_p11 = pmov %p1928_p10 }
  0x62   : > { %p1930_p13 = pmov %p1928_p10 }
  0x63   : > { %1548 = vsyncadd (%p1929_p11), [#allocation6], 4294961152 }
  0x64   : > { %1550 = dma.done.wait (%p1930_p13), [#allocation9], 128   ;;  %p1931_p2 = pmov %p1928_p10 }
  0x65   : > { %v1581_v0 = vmov 0.0   ;;  %vm1582_vm0 = vmmov 0   ;;  %v1345_v1 = vld [vmem:[#allocation5 + $0x78] sm:$0xff]   ;;  %v1348_v4 = vld [vmem:[#allocation5 + $0x70] sm:$0xff]   ;;  %v1351_v7 = vld [vmem:[#allocation5 + $0x68] sm:$0xff]   ;;  %v262_v8 = vlaneseq  ;;  %vm1583_vm4 = vmmov 1  }
  0x66   : > { %1552 = vsyncadd (%p1931_p2), [#allocation9], 4294967168  ;;  %1187 = vmatprep.subr.bf16.mxu1 %v1581_v0  ;;  %1203 = vmatprep.mubr.msk.bf16.mxu1 %vm1582_vm0, %v1581_v0  ;;  %v1346_v2 = vld [vmem:[#allocation5 + $0x38] sm:$0xff]   ;;  %v1349_v5 = vld [vmem:[#allocation5 + $0x30] sm:$0xff]   ;;  %s1124_s21 = sshll.u32 %s1633_s19, 8  ;;  %s257_s23 = scalar_lea.vmem [#allocation10], %s1053_s20 }
  0x67   : > { %1125 = vmatprep.subr.bf16.mxu0 %v1345_v1  ;;  %v1347_v3 = vld [vmem:[#allocation5 + $0xb8] sm:$0xff]   ;;  %v1350_v6 = vld [vmem:[#allocation5 + $0xb0] sm:$0xff]   ;;  %v1352_v9 = vld [vmem:[#allocation5 + $0x28] sm:$0xff]   ;;  %v1772_v13 = vshrl.u32 %v262_v8, 7  ;;  %s941_s8 = sshll.u32 %s257_s23, 4  ;;  %s1865_s12 = scalar_lea.hbm %s1914_s4, %s1124_s21  ;;  %s1867_s8 = int_to_ptr.vmem [resolvable:$true] %s941_s8 }
  0x68   : > { %1126 = vmatpush3.bf16.msra.mxu0 %v1346_v2  ;;  %1188 = vmatpush3.bf16.msra.mxu1 %v1347_v3  ;;  %v1353_v10 = vld [vmem:[#allocation5 + $0xa8] sm:$0xff]   ;;  %v1354_v11 = vld [vmem:[#allocation5 + $0x60] sm:$0xff]   ;;  %v1357_v15 = vld [vmem:[#allocation5 + $0x58] sm:$0xff]   ;;  %s928_s5 = scalar_lea.sflag [#allocation4], %s1747_s14  ;;  %s1499_s19 = scalar_lea.vmem %s1867_s8, 256 }
  0x69   : > { %1127 = vmatprep.subr.bf16.mxu0 %v1348_v4  ;;  %1189 = vmatprep.subr.bf16.mxu1 %v1581_v0  ;;  %v1355_v12 = vld [vmem:[#allocation5 + $0x20] sm:$0xff]   ;;  %v1358_v16 = vld [vmem:[#allocation5 + $0x18] sm:$0xff]   ;;  %v264_v17 = vadd.s32 8, %v1772_v13  ;;  %v1360_v19 = vld [vmem:[#allocation5 + $0x50] sm:$0xff]   ;;  %v269_v20 = vand.u32 15, %v1772_v13  ;;  %vm297_vm3 = vcmp.lt.s32.totalorder %v1772_v13, 1  ;;  %p1500_p4 = scmp.ne.s32.totalorder %s1867_s8, %s1499_s19 }
  0x6a   : > { %v1356_v14 = vld [vmem:[#allocation5 + $0xa0] sm:$0xff]   ;;  %v1359_v18 = vld [vmem:[#allocation5 + $0x98] sm:$0xff]   ;;  %v1361_v21 = vld [vmem:[#allocation5 + $0x10] sm:$0xff]   ;;  %vm304_vm6 = vcmp.lt.s32.totalorder %v1772_v13, 7  ;;  %p1938_p6 = scmp.ne.s32.totalorder %s1924_s28, 0  ;;  %s1584_s29 = smov [#allocation10]  }
  0x6b   : > { %v276_v22 = vand.u32 15, %v264_v17  ;;  %v1362_v23 = vld [vmem:[#allocation5 + $0x90] sm:$0xff]   ;;  %v1363_v24 = vld [vmem:[#allocation5 + $0x48] sm:$0xff]   ;;  %vm289_vm1 = vcmp.ne.s32.totalorder %v269_v20, 0  ;;  %v1366_v28 = vld [vmem:[#allocation5 + $0x40] sm:$0xff]   ;;  %s1503_s30 = sshll.u32 %s1584_s29, 4  ;;  %s1504_s30 = int_to_ptr.vmem [resolvable:$false] %s1503_s30 }
  0x6c   : > { %1128 = vmatpush3.bf16.msra.mxu0 %v1349_v5  ;;  %1190 = vmatpush3.bf16.msra.mxu1 %v1350_v6  ;;  %v1364_v25 = vld [vmem:[#allocation5 + $0x8] sm:$0xff]   ;;  %v1784_v29 = vld [vmem:[%s1753_s26] sm:$0xff]  ;;  %vm1790_vm5 = vmpackc.low %vm1583_vm4, %vm289_vm1  ;;  %p1501_p12 = pnand %p1500_p4, %p1938_p6  ;;  %s1505_s6 = scalar_lea.vmem %s1504_s30, 512 }
  0x6d   : > { %1129 = vmatprep.subr.bf16.mxu0 %v1351_v7  ;;  %1191 = vmatprep.subr.bf16.mxu1 %v1581_v0  ;;  %v1365_v26 = vld [vmem:[#allocation5 + $0x88] sm:$0xff]   ;;  %vm1779_vm2 = vcmp.ne.s32.totalorder %v276_v22, 15  ;;  %v1367_v32 = vld [vmem:[#allocation5] sm:$0xff]   ;;  %v295_v33 = vrot.slane %v1784_v29, 7  ;;  %v302_v35 = vrot.slane %v1784_v29, 1  ;;  %v1369_v46 = vld [vmem:[#allocation7 + $0x78] sm:$0xff]   ;;  %p1506_p5 = scmp.lt.s32.totalorder %s1867_s8, %s1504_s30  ;;  %p1507_p3 = scmp.lt.s32.totalorder %s1505_s6, %s1499_s19 }
  0x6e   : > { %v1787_v30 = vld [vmem:[%s1753_s26 + $0x8] sm:$0xff]  ;;  %vm1802_vm7 = vmpackc.low %vm1779_vm2, %vm1583_vm4  ;;  %v1368_v38 = vld [vmem:[#allocation5 + $0x80] sm:$0xff]   ;;  %v362_v7 = vsub.s32 0, %v1772_v13  ;;  %p1502_p0 = pneg %p1501_p12 }
  0x6f   : > { %v296_v34 = vrot.slane %v1787_v30, 7  ;;  %v303_v36 = vrot.slane %v1787_v30, 1  ;;  %v310_v39 = vpack.c.bf16 %v1787_v30, %v1784_v29  ;;  %v1370_v47 = vld [vmem:[#allocation7 + $0x38] sm:$0xff]   ;;  %v1372_v49 = vld [vmem:[#allocation7 + $0x70] sm:$0xff]   ;;  %v1375_v52 = vld [vmem:[#allocation7 + $0x68] sm:$0xff]   ;;  %p1508_p7 = por %p1507_p3, %p1506_p5 }
  0x70   : > { %1130 = vmatpush3.bf16.msra.mxu0 %v1352_v9  ;;  %1192 = vmatpush3.bf16.msra.mxu1 %v1353_v10  ;;  %v1371_v48 = vld [vmem:[#allocation7 + $0xb8] sm:$0xff]   ;;  %v1373_v50 = vld [vmem:[#allocation7 + $0x30] sm:$0xff]   ;;  %v1376_v53 = vld [vmem:[#allocation7 + $0x28] sm:$0xff]  }
  0x71   : > { %1131 = vmatprep.subr.bf16.mxu0 %v1354_v11  ;;  %1193 = vmatprep.subr.bf16.mxu1 %v1581_v0  ;;  %v298_v40 = vsel %vm297_vm3, %v295_v33, %v296_v34  ;;  %v299_v41 = vsel %vm297_vm3, %v296_v34, %v295_v33  ;;  %v305_v42 = vsel %vm304_vm6, %v302_v35, %v303_v36  ;;  %v1374_v51 = vld [vmem:[#allocation7 + $0xb0] sm:$0xff]   ;;  %v1377_v54 = vld [vmem:[#allocation7 + $0xa8] sm:$0xff]   ;;  %v1378_v55 = vld [vmem:[#allocation7 + $0x60] sm:$0xff]   ;;  %p1509_p9 = pnand %p1508_p7, %p1502_p0 }
  0x72   : > { %v306_v43 = vsel %vm304_vm6, %v303_v36, %v302_v35  ;;  %540 = vmatprep.mubr.bf16.mxu0 %v310_v39  ;;  %v1083_v44 = vpack.c.bf16 %v298_v40, %v299_v41  ;;  %v1379_v56 = vld [vmem:[#allocation7 + $0x20] sm:$0xff]   ;;  %v1381_v58 = vld [vmem:[#allocation7 + $0x58] sm:$0xff]   ;;  %v1384_v61 = vld [vmem:[#allocation7 + $0x50] sm:$0xff]  }
  0x73   : > { %v1086_v45 = vpack.c.bf16 %v306_v43, %v305_v42  ;;  %v1380_v57 = vld [vmem:[#allocation7 + $0xa0] sm:$0xff]   ;;  %v1382_v59 = vld [vmem:[#allocation7 + $0x18] sm:$0xff]   ;;  %v1385_v62 = vld [vmem:[#allocation7 + $0x10] sm:$0xff]  }
  0x74   : > { %1132 = vmatpush3.bf16.msra.mxu0 %v1355_v12  ;;  %1194 = vmatpush3.bf16.msra.mxu1 %v1356_v14  ;;  %v1383_v60 = vld [vmem:[#allocation7 + $0x98] sm:$0xff]   ;;  %v1386_v63 = vld [vmem:[#allocation7 + $0x90] sm:$0xff]   ;;  %v1387_v1 = vld [vmem:[#allocation7 + $0x48] sm:$0xff]   ;;  %v592_v12 = vsub.s32 1, %v1772_v13 }
  0x75   : > { %1133 = vmatprep.subr.bf16.mxu0 %v1357_v15  ;;  %1195 = vmatprep.subr.bf16.mxu1 %v1581_v0  ;;  %v1388_v2 = vld [vmem:[#allocation7 + $0x8] sm:$0xff]   ;;  %v1390_v4 = vld [vmem:[#allocation7 + $0x40] sm:$0xff]  }
  0x76   : > { %v1389_v3 = vld [vmem:[#allocation7 + $0x88] sm:$0xff]   ;;  %v1391_v5 = vld [vmem:[#allocation7] sm:$0xff]  }
  0x77   : > { %v1392_v6 = vld [vmem:[#allocation7 + $0x80] sm:$0xff]  }
  0x78   : > { %1134 = vmatpush3.bf16.msra.mxu0 %v1358_v16  ;;  %1196 = vmatpush3.bf16.msra.mxu1 %v1359_v18  ;;  %v1832_v8 = vld [vmem:[#allocation8] sm:$0xff] }
  0x79   : > { %1135 = vmatprep.subr.bf16.mxu0 %v1360_v19  ;;  %1197 = vmatprep.subr.bf16.mxu1 %v1581_v0  ;;  %v363_v11 = vrot.slane %v1832_v8, %v362_v7 }
  0x7c   : > { %1136 = vmatpush3.bf16.msra.mxu0 %v1361_v21  ;;  %1198 = vmatpush3.bf16.msra.mxu1 %v1362_v23 }
  0x7d   : > { %1137 = vmatprep.subr.bf16.mxu0 %v1363_v24  ;;  %1199 = vmatprep.subr.bf16.mxu1 %v1581_v0 }
  0x80   : > { %1138 = vmatpush3.bf16.msra.mxu0 %v1364_v25  ;;  %1200 = vmatpush3.bf16.msra.mxu1 %v1365_v26 }
  0x81   : > { %1139 = vmatprep.subr.bf16.mxu0 %v1366_v28  ;;  %1201 = vmatprep.subr.bf16.mxu1 %v1581_v0 }
  0x84   : > { %1140 = vmatpush3.bf16.msra.mxu0 %v1367_v32  ;;  %1202 = vmatpush3.bf16.msra.mxu1 %v1368_v38  ;;  %v604_v38 = vsub.s32 2, %v1772_v13 }
  0x85   : > { %1207 = vmatprep.subr.bf16.mxu1 %v1581_v0  ;;  %1156 = vmatprep.subr.bf16.mxu0 %v1369_v46 }
  0x86   : > { %v605_v46 = vrot.slane %v1832_v8, %v604_v38 }
  0x87   : > { %1084 = vmatmul.mubr.msk.bf16.vlgmr.msra.gmra.mxu0 %vm1790_vm5, %v1083_v44  ;;  %1204 = vmatmul.mubr.msk.bf16.vlgmr.msra.gmra.mxu1 %vm1802_vm7, %v1086_v45 }
  0x88   : > { %1223 = vmatprep.mubr.msk.bf16.mxu1 %vm1582_vm0, %v1581_v0  ;;  %1157 = vmatpush3.bf16.msra.mxu0 %v1370_v47 }
  0x89   : > { %1208 = vmatpush3.bf16.msra.mxu1 %v1371_v48  ;;  %1158 = vmatprep.subr.bf16.mxu0 %v1372_v49 }
  0x8a   : > { %1209 = vmatprep.subr.bf16.mxu1 %v1581_v0 }
  0x8c   : > { %1159 = vmatpush3.bf16.msra.mxu0 %v1373_v50 }
  0x8d   : > { %1210 = vmatpush3.bf16.msra.mxu1 %v1374_v51  ;;  %1160 = vmatprep.subr.bf16.mxu0 %v1375_v52 }
  0x8e   : > { %1211 = vmatprep.subr.bf16.mxu1 %v1581_v0 }
  0x90   : > { %1161 = vmatpush3.bf16.msra.mxu0 %v1376_v53 }
  0x91   : > { %1212 = vmatpush3.bf16.msra.mxu1 %v1377_v54  ;;  %1162 = vmatprep.subr.bf16.mxu0 %v1378_v55 }
  0x92   : > { %1213 = vmatprep.subr.bf16.mxu1 %v1581_v0 }
  0x94   : > { %1163 = vmatpush3.bf16.msra.mxu0 %v1379_v56 }
  0x95   : > { %1214 = vmatpush3.bf16.msra.mxu1 %v1380_v57  ;;  %1164 = vmatprep.subr.bf16.mxu0 %v1381_v58 }
  0x96   : > { %1215 = vmatprep.subr.bf16.mxu1 %v1581_v0 }
  0x98   : > { %1165 = vmatpush3.bf16.msra.mxu0 %v1382_v59 }
  0x99   : > { %1216 = vmatpush3.bf16.msra.mxu1 %v1383_v60  ;;  %1166 = vmatprep.subr.bf16.mxu0 %v1384_v61 }
  0x9a   : > { %1217 = vmatprep.subr.bf16.mxu1 %v1581_v0 }
  0x9c   : > { %1167 = vmatpush3.bf16.msra.mxu0 %v1385_v62 }
  0x9d   : > { %1218 = vmatpush3.bf16.msra.mxu1 %v1386_v63  ;;  %1168 = vmatprep.subr.bf16.mxu0 %v1387_v1 }
  0x9e   : > { %1219 = vmatprep.subr.bf16.mxu1 %v1581_v0 }
  0xa0   : > { %1169 = vmatpush3.bf16.msra.mxu0 %v1388_v2 }
  0xa1   : > { %1220 = vmatpush3.bf16.msra.mxu1 %v1389_v3  ;;  %1170 = vmatprep.subr.bf16.mxu0 %v1390_v4  ;;  %v675_v4 = vsub.s32 3, %v1772_v13 }
  0xa2   : > { %1221 = vmatprep.subr.bf16.mxu1 %v1581_v0  ;;  %v593_v0 = vrot.slane %v1832_v8, %v592_v12 }
  0xa3   : > { %v676_v7 = vrot.slane %v1832_v8, %v675_v4 }
  0xa4   : > { %1171 = vmatpush3.bf16.msra.mxu0 %v1391_v5 }
  0xa5   : > { %1222 = vmatpush3.bf16.msra.mxu1 %v1392_v6 }
 0x147   : > { %v1141_v9 = vpop.f32.mrf.mxu0  ;;  %v583_v10 = vpop.f32.mrf.mxu1 }
 0x149   : > { %v1142_v14 = vpop.f32.mrf.mxu0  ;;  %v1205_v16 = vpop.f32.mrf.mxu1 }
 0x14a   : > { %v1143_v15 = vadd.f32 %v1142_v14, %v1141_v9  ;;  %v905_v9 = vsub.s32 4, %v1772_v13 }
 0x14b   : > { %v1144_v17 = vpop.f32.mrf.mxu0  ;;  %v586_v19 = vpop.f32.mrf.mxu1 }
 0x14c   : > { %v543_v18 = vadd.f32 %v1143_v15, %v363_v11  ;;  %v906_v31 = vrot.slane %v1832_v8, %v905_v9 }
 0x14d   : > { %v1145_v20 = vpop.f32.mrf.mxu0  ;;  %v1206_v23 = vpop.f32.mrf.mxu1 }
 0x14e   : > { %v584_v21 = vadd.f32 %v583_v10, %v543_v18  ;;  %v1146_v22 = vadd.f32 %v1145_v20, %v1144_v17 }
 0x150   : > { %v594_v24 = vmul.f32 %v593_v0, %v584_v21  ;;  %v546_v25 = vadd.f32 %v1146_v22, %v363_v11 }
 0x152   : > { %v1229_v26 = vcvt.f32.s32 %v594_v24  ;;  %v587_v27 = vadd.f32 %v586_v19, %v546_v25  ;;  %v1227_v33 = vand.u32 2147483647, %v594_v24  ;;  %v1232_v35 = vand.u32 2147483648, %v594_v24 }
 0x154   : > { %v1230_v28 = vcvt.s32.f32 %v1229_v26  ;;  %v595_v32 = vmul.f32 %v593_v0, %v587_v27  ;;  %vm1228_vm8 = vcmp.lt.f32.partialorder %v1227_v33, 8388608.0 }
 0x156   : > { %v1231_v34 = vand.u32 2147483647, %v1230_v28  ;;  %v1237_v36 = vcvt.f32.s32 %v595_v32  ;;  %v1235_v41 = vand.u32 2147483647, %v595_v32  ;;  %v1240_v43 = vand.u32 2147483648, %v595_v32 }
 0x158   : > { %v1238_v39 = vcvt.s32.f32 %v1237_v36  ;;  %v1233_v40 = vor.u32 %v1232_v35, %v1231_v34  ;;  %vm1236_vm9 = vcmp.lt.f32.partialorder %v1235_v41, 8388608.0 }
 0x15a   : > { %v1239_v42 = vand.u32 2147483647, %v1238_v39  ;;  %v1234_v44 = vsel %vm1228_vm8, %v1233_v40, %v594_v24 }
 0x15b   : > { %v598_v45 = vmax.f32 %v1234_v44, -128.0 }
 0x15c   : > { %v1241_v47 = vor.u32 %v1240_v43, %v1239_v42 }
 0x15d   : > { %v600_v48 = vmin.f32 %v598_v45, 127.0 }
 0x15e   : > { %v1242_v49 = vsel %vm1236_vm9, %v1241_v47, %v595_v32  ;;  %v917_v32 = vsub.s32 5, %v1772_v13 }
 0x15f   : > { %v599_v50 = vmax.f32 %v1242_v49, -128.0  ;;  %v606_v51 = vmul.f32 %v605_v46, %v600_v48 }
 0x160   : > { %v918_v41 = vrot.slane %v1832_v8, %v917_v32 }
 0x161   : > { %v601_v52 = vmin.f32 %v599_v50, 127.0  ;;  %v608_v53 = vmax.f32 %v606_v51, 0.0 }
 0x163   : > { %v607_v54 = vmul.f32 %v605_v46, %v601_v52  ;;  %v610_v56 = vrot.slane %v608_v53, 7  ;;  %v616_v58 = vrot.slane %v608_v53, 1 }
 0x165   : > { %v609_v55 = vmax.f32 %v607_v54, 0.0 }
 0x167   : > { %v611_v57 = vrot.slane %v609_v55, 7  ;;  %v617_v59 = vrot.slane %v609_v55, 1  ;;  %v623_v60 = vpack.c.bf16 %v609_v55, %v608_v53 }
 0x169   : > { %853 = vmatprep.mubr.bf16.mxu0 %v623_v60  ;;  %v612_v61 = vsel %vm297_vm3, %v610_v56, %v611_v57  ;;  %v613_v62 = vsel %vm297_vm3, %v611_v57, %v610_v56  ;;  %v618_v63 = vsel %vm304_vm6, %v616_v58, %v617_v59  ;;  %v619_v1 = vsel %vm304_vm6, %v617_v59, %v616_v58 }
 0x16a   : > { %v1113_v2 = vpack.c.bf16 %v612_v61, %v613_v62  ;;  %v1116_v3 = vpack.c.bf16 %v619_v1, %v618_v63 }
 0x16c   : > { %1114 = vmatmul.mubr.msk.bf16.vlgmr.msra.gmra.mxu0 %vm1790_vm5, %v1113_v2  ;;  %1224 = vmatmul.mubr.msk.bf16.vlgmr.msra.gmra.mxu1 %vm1802_vm7, %v1116_v3 }
 0x22c   : > { %v1172_v5 = vpop.f32.mrf.mxu0  ;;  %v896_v6 = vpop.f32.mrf.mxu1 }
 0x22e   : > { %v1173_v10 = vpop.f32.mrf.mxu0  ;;  %v1225_v11 = vpop.f32.mrf.mxu1 }
 0x22f   : > { %v1174_v12 = vadd.f32 %v1173_v10, %v1172_v5 }
 0x230   : > { %v1175_v14 = vpop.f32.mrf.mxu0  ;;  %v899_v15 = vpop.f32.mrf.mxu1 }
 0x231   : > { %v856_v16 = vadd.f32 %v1174_v12, %v676_v7 }
 0x232   : > { %v1176_v17 = vpop.f32.mrf.mxu0  ;;  %v1226_v18 = vpop.f32.mrf.mxu1 }
 0x233   : > { %v897_v37 = vadd.f32 %v896_v6, %v856_v16  ;;  %v1177_v0 = vadd.f32 %v1176_v17, %v1175_v14 }
 0x235   : > { %v907_v19 = vmul.f32 %v906_v31, %v897_v37  ;;  %v859_v20 = vadd.f32 %v1177_v0, %v676_v7 }
 0x237   : > { %v1245_v21 = vcvt.f32.s32 %v907_v19  ;;  %v900_v22 = vadd.f32 %v899_v15, %v859_v20  ;;  %v1243_v25 = vand.u32 2147483647, %v907_v19  ;;  %v1248_v27 = vand.u32 2147483648, %v907_v19 }
 0x239   : > { %v1246_v23 = vcvt.s32.f32 %v1245_v21  ;;  %v908_v24 = vmul.f32 %v906_v31, %v900_v22  ;;  %vm1244_vm10 = vcmp.lt.f32.partialorder %v1243_v25, 8388608.0 }
 0x23b   : > { %v1247_v26 = vand.u32 2147483647, %v1246_v23  ;;  %v1253_v28 = vcvt.f32.s32 %v908_v24  ;;  %v1251_v35 = vand.u32 2147483647, %v908_v24  ;;  %v1256_v39 = vand.u32 2147483648, %v908_v24 }
 0x23d   : > { %v1249_v33 = vor.u32 %v1248_v27, %v1247_v26  ;;  %v1254_v34 = vcvt.s32.f32 %v1253_v28  ;;  %vm1252_vm11 = vcmp.lt.f32.partialorder %v1251_v35, 8388608.0 }
 0x23f   : > { %v1250_v36 = vsel %vm1244_vm10, %v1249_v33, %v907_v19  ;;  %v1255_v38 = vand.u32 2147483647, %v1254_v34 }
 0x240   : > { %v911_v40 = vmax.f32 %v1250_v36, -128.0 }
 0x241   : > { %v1257_v42 = vor.u32 %v1256_v39, %v1255_v38 }
 0x242   : > { %v913_v43 = vmin.f32 %v911_v40, 127.0 }
 0x243   : > { %v1258_v44 = vsel %vm1252_vm11, %v1257_v42, %v908_v24 }
 0x244   : > { %v919_v45 = vmul.f32 %v918_v41, %v913_v43  ;;  %v912_v46 = vmax.f32 %v1258_v44, -128.0 }
 0x246   : > { %v921_v13 = vadd.f32 %v919_v45, %v1784_v29  ;;  %v914_v47 = vmin.f32 %v912_v46, 127.0 }
 0x248   : > { %v923_v48 = vmax.f32 %v921_v13, 0.0  ;;  %v920_v49 = vmul.f32 %v918_v41, %v914_v47 }
 0x24a   : > { %v922_v50 = vadd.f32 %v920_v49, %v1787_v30  ;;  %925 = vst [vmem:[%s257_s23] sm:$0xff] %v923_v48 }
 0x24c   : > { %v924_v29 = vmax.f32 %v922_v50, 0.0 }
 0x24e   : > { %926 = vst [vmem:[%s257_s23 + $0x8] sm:$0xff] %v924_v29 }
 0x24f   : > { %1512 = shalt.err (!%p1509_p9)
}
 0x250   : > { %s1513_s7 = scalar_lea.hbm %s1865_s12, 256  ;;  %s1517_s20 = scalar_lea.hbm %s1914_s4, 512 }
 0x251   : > { %p1514_p1 = scmp.ne.s32.totalorder %s1865_s12, %s1513_s7  ;;  %p1518_p11 = scmp.lt.s32.totalorder %s1865_s12, %s1914_s4 }
 0x252   : > { %p1519_p13 = scmp.lt.s32.totalorder %s1517_s20, %s1513_s7 }
 0x253   : > { %p1515_p8 = pnand %p1514_p1, %p1938_p6 }
 0x254   : > { %p1520_p2 = por %p1519_p13, %p1518_p11 }
 0x255   : > { %p1516_p10 = pneg %p1515_p8 }
 0x257   : > { %p1521_p4 = pnand %p1520_p2, %p1516_p10 }
 0x259   : > { %1524 = shalt.err (!%p1521_p4)
}
 0x25a   : > { %s1585_s21 = smov 128   ;;  %s1586_s23 = smov 8  }
 0x25b   : > { %1273 = dma.vmem_to_hbm [thread:$0]  (%p1938_p6), %s1867_s8, 256, %s1865_s12, %s928_s5, %s1585_s21, %s1585_s21, %s1586_s23  }
 0x25c PF: > { %s956_s10 = sand.u32 1, %s1559_s15   ;;  %p1939_p12 = scmp.ne.s32.totalorder %s1920_s22, 0 }
 0x25d   : > { %p1940_p0 = scmp.ge.s32.totalorder %s1571_s18, 2  ;;  %s957_s11 = scalar_lea.sflag [#allocation4], %s956_s10 }
 0x25f   : > { %p1290_p5 = pnand %p1940_p0, %p1939_p12 }
 0x261   : > { %p1291_p3 = pneg %p1290_p5 }
 0x263   : > { %1554 = dma.done.wait (%p1291_p3), %s957_s11, 256  }
 0x264   : > { %1556 = vsyncadd (%p1291_p3), %s957_s11, 4294967040  ;;  %p19_p7 = scmp.ge.s32.totalorder %s1692_s24, 4   ;;  %s1941_s15 = smov %s1563_s16 }
 0x265   : > { %s1942_s16 = smov %s1567_s17  ;;  %s1943_s17 = smov %s1702_s27 }
 0x266   : > { %s1944_s18 = smov %s1692_s24  ;;  %21 = sbr.rel (!%p19_p7) target bundleno = 7 (0x7), region = 93 }
 0x26b   :  { %962 = vsyncpa [#allocation3], 1 }
 0x26c   :  { %964 = vsyncpa [#allocation3 + $0x1], 1 }
 0x26d   :  { %965 = vsyncpa [#allocation6], 1 }
 0x26e   :  { %966 = vsyncpa [#allocation9], 1 }
 0x26f   :  { %967 = vsyncpa [#allocation4], 1 }
 0x270   :  { %969 = vsyncpa [#allocation4 + $0x1], 1 }

</bundles_post_ra>
